<compile_context>
chip_gen: v5e
topology: v5e:2x2
jax: 0.10.0
libtpu: 0.0.40
codegen_flags: <defaults>
</compile_context>

<pallas_src>
import math
from functools import partial

import jax
import jax.numpy as jnp
from jax.experimental import pallas as pl
from jax.experimental.pallas import tpu as pltpu

# ---- shared-range-reduction sincos constants (float32 Cody-Waite) ----------
_TWO_OVER_PI = 0.6366197723675814
_PIO2_HI = 1.5707855224609375      # pi/2 with 7 trailing mantissa bits zeroed
_PIO2_LO = 1.080433395911923e-05   # pi/2 - _PIO2_HI
# Taylor coefficients on |r| <= pi/4 (poly error < 4e-7, far below tolerance).
_S1, _S2, _S3 = -1.0 / 6.0, 1.0 / 120.0, -1.0 / 5040.0
_CC1, _CC2, _CC3, _CC4 = -0.5, 1.0 / 24.0, -1.0 / 720.0, 1.0 / 40320.0

_TILE_CAP = 8192  # 128 ch x 8192 px x 4 B = 4 MiB/block (8 MiB double-buffered)
_CHUNK = 512      # in-kernel compute/store granule along the lane axis


def _pe_kernel(g_ref, out_ref, *, h: int, w: int, f: int, chunk: int):
    """One pixel-block of the positional encoding.

    g_ref:   (F, 2)   column 0 = 2*pi*G[0] (x freqs), column 1 = 2*pi*G[1].
    out_ref: (2*F, TP) rows [0, F) = sin, rows [F, 2F) = cos, flattened
             row-major pixels on the lane axis.
    """
    tp = out_ref.shape[1]
    n_chunks = tp // chunk

    gx = g_ref[:, 0:1]  # (F, 1)
    gy = g_ref[:, 1:2]  # (F, 1)

    base = pl.program_id(0) * tp
    lane = jax.lax.broadcasted_iota(jnp.int32, (1, chunk), 1)

    @pl.loop(0, n_chunks)
    def _(c):
        off = pl.multiple_of(c * chunk, chunk)

        # Global flattened pixel index of each lane (exact: hw < 2**22).
        q = (base + off + lane).astype(jnp.float32)            # (1, chunk)
        # row = q // w, col = q % w in f32.  The +0.5 keeps the true quotient
        # 0.5/w away from every integer boundary so a single rounding of the
        # divide can never flip the floor (guarded by the hw assert below).
        row = jnp.floor((q + 0.5) / float(w))
        col = q - row * float(w)
        # Pixel-center coords; same rounding steps as the reference's
        # 2*((cumsum - 0.5)/dim) - 1, so the coordinates match bit-for-bit.
        xs = (col + 0.5) / float(w) * 2.0 - 1.0                # (1, chunk)
        ys = (row + 0.5) / float(h) * 2.0 - 1.0                # (1, chunk)

        proj = gx * xs + gy * ys                               # (F, chunk)

        # ---- shared-range-reduction sincos ----------------------------------
        # Valid while |proj| <~ 200 (|k| <= 128 keeps k*_PIO2_HI exact); for a
        # unit-scale Gaussian matrix |proj| <= 2*pi*(|G0|+|G1|) is ~40.
        kf = jnp.floor(proj * _TWO_OVER_PI + 0.5)
        r = (proj - kf * _PIO2_HI) - kf * _PIO2_LO             # |r| <= ~pi/4
        r2 = r * r
        sin_r = r * (1.0 + r2 * (_S1 + r2 * (_S2 + r2 * _S3)))
        cos_r = 1.0 + r2 * (_CC1 + r2 * (_CC2 + r2 * (_CC3 + r2 * _CC4)))

        n = kf.astype(jnp.int32) & 3
        swap = (n & 1) == 1                 # odd quadrant: sin<->cos swap
        s_val = jnp.where(swap, cos_r, sin_r)
        c_val = jnp.where(swap, sin_r, cos_r)
        sin_out = jnp.where((n & 2) == 2, -s_val, s_val)
        cos_out = jnp.where(((n + 1) & 2) == 2, -c_val, c_val)

        out_ref[0:f, pl.ds(off, chunk)] = sin_out.astype(out_ref.dtype)
        out_ref[f:2 * f, pl.ds(off, chunk)] = cos_out.astype(out_ref.dtype)


def _pick_tile(hw: int):
    """Pixel tile and in-kernel chunk size.  tile % chunk == 0.

    * Capped at 8192 px (4 MiB output block; 8 MiB double buffered fits the
      default scoped-VMEM limit on v5e/v6e/v7x, no vmem_limit_bytes needed).
    * >= 2 blocks whenever hw allows, so v7x's second TensorCore gets work.
    """
    if hw <= 128:
        return hw, hw                       # single tiny full-extent block
    half = pl.cdiv(hw, 2)
    if half <= _CHUNK:
        tp = pl.cdiv(half, 128) * 128       # 128-lane granule, one chunk/block
        return tp, tp
    tp = min(_TILE_CAP, pl.cdiv(half, _CHUNK) * _CHUNK)
    return tp, _CHUNK


def position_embedding_random(gaussian_matrix: jax.Array, size,
                              *, out_dtype=jnp.float32) -> jax.Array:
    """Equivalent of PositionEmbeddingRandom.forward(size).

    Args:
      gaussian_matrix: (2, num_pos_feats) float32 registered buffer.
      size: (h, w) grid size.
      out_dtype: output dtype (float32 default; bf16 helps writeback-bound v5e).

    Returns:
      (2 * num_pos_feats, h, w) positional encoding (CHW, like PyTorch).
    """
    h, w = int(size[0]), int(size[1])
    f = int(gaussian_matrix.shape[1])
    hw = h * w
    # f32 flattened-index math (q, row*w) must stay exact and the 0.5/w floor
    # margin must dominate the divide rounding -> guard the pixel count.
    assert hw < (1 << 22), f"grid too large for f32 index math: {h}x{w}"

    # Fold 2*pi into the tiny frequency matrix once; pack the x / y frequency
    # rows as the two columns of a single (F, 2) input (freqs along sublanes).
    g2 = jnp.transpose(gaussian_matrix.astype(jnp.float32) * (2.0 * math.pi))

    tp, chunk = _pick_tile(hw)
    assert tp % chunk == 0
    grid = (pl.cdiv(hw, tp),)
    out_itemsize = jax.dtypes.canonicalize_dtype(out_dtype).itemsize

    pe_flat = pl.pallas_call(
        partial(_pe_kernel, h=h, w=w, f=f, chunk=chunk),
        out_shape=jax.ShapeDtypeStruct((2 * f, hw), out_dtype),
        grid_spec=pltpu.PrefetchScalarGridSpec(
            num_scalar_prefetch=0,
            grid=grid,
            in_specs=[pl.BlockSpec((f, 2), lambda i: (0, 0))],
            out_specs=pl.BlockSpec((2 * f, tp), lambda i: (0, i)),
        ),
        compiler_params=pltpu.CompilerParams(
            dimension_semantics=("parallel",),
        ),
        cost_estimate=pl.CostEstimate(
            flops=36 * f * hw,
            transcendentals=2 * f * hw,
            bytes_accessed=2 * f * hw * out_itemsize + 2 * f * 4,
        ),
    )(g2)

    # Free minor-dim split: (2F, H*W) -> (2F, H, W) == PyTorch's CHW output.
    return pe_flat.reshape(2 * f, h, w)


def _reference(gaussian_matrix: jax.Array, size) -> jax.Array:
    """Pure-JAX reference mirroring the PyTorch module."""
    h, w = size
    grid = jnp.ones((h, w), jnp.float32)
    y_embed = (jnp.cumsum(grid, axis=0) - 0.5) / h
    x_embed = (jnp.cumsum(grid, axis=1) - 0.5) / w
    x = 2.0 * x_embed - 1.0
    y = 2.0 * y_embed - 1.0
    # `coords @ G` written out elementwise so TPU's reduced default matmul
    # precision (bf16 MXU passes) cannot pollute the reference.
    coords = x[..., None] * gaussian_matrix[0] + y[..., None] * gaussian_matrix[1]
    coords = 2.0 * math.pi * coords
    pe = jnp.concatenate([jnp.sin(coords), jnp.cos(coords)], axis=-1)
    return jnp.transpose(pe, (2, 0, 1))


if __name__ == "__main__":
    num_pos_feats = 64
    scale = 1.0

    # Deterministic "buffer" init (stand-in for scale * torch.randn((2, F))).
    key = jax.random.PRNGKey(0)
    gaussian_matrix = scale * jax.random.normal(key, (2, num_pos_feats), jnp.float32)

    # (16,16): 2 blocks of 128 px, single-chunk path; (64,64): SAM's grid,
    # 2 blocks of 2048 px, exercises the 4-iteration in-kernel chunk loop.
    for size in [(16, 16), (64, 64)]:
        pe = jax.block_until_ready(position_embedding_random(gaussian_matrix, size))
        assert pe.shape == (2 * num_pos_feats, size[0], size[1]), pe.shape
        ref = _reference(gaussian_matrix, size)
        err = float(jnp.max(jnp.abs(pe - ref)))
        # 2e-5 abs tolerance: a few ulps of the |argument| (~25) from the
        # different f32 rounding order (host-folded 2*pi vs. post-dot scale)
        # plus <2e-6 from the hand-rolled vs. XLA sin/cos implementations.
        assert err < 2e-5, err

    # TODO(synk): forward_with_coords / _pe_encoding over arbitrary point sets
    # is a separate entry point and is not implemented here.
    print("KERNEL_OK")
</pallas_src>

<mosaic_0001>
module attributes {stable_mosaic.version = 11 : i64} {
  func.func @_pe_kernel(%arg0: i32, %arg1: memref<64x2xf32, #tpu.memory_space<vmem>>, %arg2: memref<128x128xf32, #tpu.memory_space<vmem>>) attributes {dimension_semantics = [#tpu.dimension_semantics<parallel>], iteration_bounds = array<i64: 2>, scalar_prefetch = 0 : i64, scratch_operands = 0 : i64, tpu.core_type = #tpu.core_type<tc>, window_params = [{pipeline_mode = #tpu.pipeline_mode<synchronous>, transform_indices = @transform_0, window_bounds = array<i64: 64, 2>}, {transform_indices = @transform_1, window_bounds = array<i64: 128, 128>}]} {
    %c0 = arith.constant 0 : index
    %c0_0 = arith.constant 0 : index
    %0 = vector.load %arg1[%c0, %c0_0] : memref<64x2xf32, #tpu.memory_space<vmem>>, vector<64x1xf32>
    %c0_1 = arith.constant 0 : index
    %c1 = arith.constant 1 : index
    %1 = vector.load %arg1[%c0_1, %c1] : memref<64x2xf32, #tpu.memory_space<vmem>>, vector<64x1xf32>
    %c128_i32 = arith.constant 128 : i32
    %2 = arith.muli %arg0, %c128_i32 : i32
    %3 = tpu.iota {dimensions = array<i32: 1>} : vector<1x128xi32>
    %c0_i32 = arith.constant 0 : i32
    %c1_i32 = arith.constant 1 : i32
    %4 = arith.muli %c0_i32, %c1_i32 : i32
    %c0_i32_2 = arith.constant 0 : i32
    %5 = arith.addi %c0_i32_2, %4 : i32
    %c128_i32_3 = arith.constant 128 : i32
    %6 = arith.muli %5, %c128_i32_3 : i32
    %7 = tpu.assume_multiple %6, 128 : i32
    %8 = arith.addi %2, %7 : i32
    %9 = vector.broadcast %8 : i32 to vector<1x128xi32>
    %10 = arith.addi %9, %3 : vector<1x128xi32>
    %11 = arith.sitofp %10 : vector<1x128xi32> to vector<1x128xf32>
    %cst = arith.constant 5.000000e-01 : f32
    %12 = vector.broadcast %cst : f32 to vector<1x128xf32>
    %13 = arith.addf %11, %12 : vector<1x128xf32>
    %cst_4 = arith.constant 1.600000e+01 : f32
    %14 = vector.broadcast %cst_4 : f32 to vector<1x128xf32>
    %15 = arith.divf %13, %14 : vector<1x128xf32>
    %16 = math.floor %15 : vector<1x128xf32>
    %cst_5 = arith.constant 1.600000e+01 : f32
    %17 = vector.broadcast %cst_5 : f32 to vector<1x128xf32>
    %18 = arith.mulf %16, %17 : vector<1x128xf32>
    %19 = arith.subf %11, %18 : vector<1x128xf32>
    %cst_6 = arith.constant 5.000000e-01 : f32
    %20 = vector.broadcast %cst_6 : f32 to vector<1x128xf32>
    %21 = arith.addf %19, %20 : vector<1x128xf32>
    %cst_7 = arith.constant 1.600000e+01 : f32
    %22 = vector.broadcast %cst_7 : f32 to vector<1x128xf32>
    %23 = arith.divf %21, %22 : vector<1x128xf32>
    %cst_8 = arith.constant 2.000000e+00 : f32
    %24 = vector.broadcast %cst_8 : f32 to vector<1x128xf32>
    %25 = arith.mulf %23, %24 : vector<1x128xf32>
    %cst_9 = arith.constant 1.000000e+00 : f32
    %26 = vector.broadcast %cst_9 : f32 to vector<1x128xf32>
    %27 = arith.subf %25, %26 : vector<1x128xf32>
    %cst_10 = arith.constant 5.000000e-01 : f32
    %28 = vector.broadcast %cst_10 : f32 to vector<1x128xf32>
    %29 = arith.addf %16, %28 : vector<1x128xf32>
    %cst_11 = arith.constant 1.600000e+01 : f32
    %30 = vector.broadcast %cst_11 : f32 to vector<1x128xf32>
    %31 = arith.divf %29, %30 : vector<1x128xf32>
    %cst_12 = arith.constant 2.000000e+00 : f32
    %32 = vector.broadcast %cst_12 : f32 to vector<1x128xf32>
    %33 = arith.mulf %31, %32 : vector<1x128xf32>
    %cst_13 = arith.constant 1.000000e+00 : f32
    %34 = vector.broadcast %cst_13 : f32 to vector<1x128xf32>
    %35 = arith.subf %33, %34 : vector<1x128xf32>
    %36 = vector.broadcast %0 : vector<64x1xf32> to vector<64x128xf32>
    %37 = vector.broadcast %27 : vector<1x128xf32> to vector<64x128xf32>
    %38 = arith.mulf %36, %37 : vector<64x128xf32>
    %39 = vector.broadcast %1 : vector<64x1xf32> to vector<64x128xf32>
    %40 = vector.broadcast %35 : vector<1x128xf32> to vector<64x128xf32>
    %41 = arith.mulf %39, %40 : vector<64x128xf32>
    %42 = arith.addf %38, %41 : vector<64x128xf32>
    %cst_14 = arith.constant 0.636619746 : f32
    %43 = vector.broadcast %cst_14 : f32 to vector<64x128xf32>
    %44 = arith.mulf %42, %43 : vector<64x128xf32>
    %cst_15 = arith.constant 5.000000e-01 : f32
    %45 = vector.broadcast %cst_15 : f32 to vector<64x128xf32>
    %46 = arith.addf %44, %45 : vector<64x128xf32>
    %47 = math.floor %46 : vector<64x128xf32>
    %cst_16 = arith.constant 1.57078552 : f32
    %48 = vector.broadcast %cst_16 : f32 to vector<64x128xf32>
    %49 = arith.mulf %47, %48 : vector<64x128xf32>
    %50 = arith.subf %42, %49 : vector<64x128xf32>
    %cst_17 = arith.constant 1.08043341E-5 : f32
    %51 = vector.broadcast %cst_17 : f32 to vector<64x128xf32>
    %52 = arith.mulf %47, %51 : vector<64x128xf32>
    %53 = arith.subf %50, %52 : vector<64x128xf32>
    %54 = arith.mulf %53, %53 : vector<64x128xf32>
    %cst_18 = arith.constant -1.98412701E-4 : f32
    %55 = vector.broadcast %cst_18 : f32 to vector<64x128xf32>
    %56 = arith.mulf %54, %55 : vector<64x128xf32>
    %cst_19 = arith.constant 0.00833333377 : f32
    %57 = vector.broadcast %cst_19 : f32 to vector<64x128xf32>
    %58 = arith.addf %57, %56 : vector<64x128xf32>
    %59 = arith.mulf %54, %58 : vector<64x128xf32>
    %cst_20 = arith.constant -0.166666672 : f32
    %60 = vector.broadcast %cst_20 : f32 to vector<64x128xf32>
    %61 = arith.addf %60, %59 : vector<64x128xf32>
    %62 = arith.mulf %54, %61 : vector<64x128xf32>
    %cst_21 = arith.constant 1.000000e+00 : f32
    %63 = vector.broadcast %cst_21 : f32 to vector<64x128xf32>
    %64 = arith.addf %63, %62 : vector<64x128xf32>
    %65 = arith.mulf %53, %64 : vector<64x128xf32>
    %cst_22 = arith.constant 2.48015876E-5 : f32
    %66 = vector.broadcast %cst_22 : f32 to vector<64x128xf32>
    %67 = arith.mulf %54, %66 : vector<64x128xf32>
    %cst_23 = arith.constant -0.00138888892 : f32
    %68 = vector.broadcast %cst_23 : f32 to vector<64x128xf32>
    %69 = arith.addf %68, %67 : vector<64x128xf32>
    %70 = arith.mulf %54, %69 : vector<64x128xf32>
    %cst_24 = arith.constant 0.0416666679 : f32
    %71 = vector.broadcast %cst_24 : f32 to vector<64x128xf32>
    %72 = arith.addf %71, %70 : vector<64x128xf32>
    %73 = arith.mulf %54, %72 : vector<64x128xf32>
    %cst_25 = arith.constant -5.000000e-01 : f32
    %74 = vector.broadcast %cst_25 : f32 to vector<64x128xf32>
    %75 = arith.addf %74, %73 : vector<64x128xf32>
    %76 = arith.mulf %54, %75 : vector<64x128xf32>
    %cst_26 = arith.constant 1.000000e+00 : f32
    %77 = vector.broadcast %cst_26 : f32 to vector<64x128xf32>
    %78 = arith.addf %77, %76 : vector<64x128xf32>
    %79 = arith.fptosi %47 : vector<64x128xf32> to vector<64x128xi32>
    %c3_i32 = arith.constant 3 : i32
    %80 = vector.broadcast %c3_i32 : i32 to vector<64x128xi32>
    %81 = arith.andi %79, %80 : vector<64x128xi32>
    %c1_i32_27 = arith.constant 1 : i32
    %82 = vector.broadcast %c1_i32_27 : i32 to vector<64x128xi32>
    %83 = arith.andi %81, %82 : vector<64x128xi32>
    %c1_i32_28 = arith.constant 1 : i32
    %84 = vector.broadcast %c1_i32_28 : i32 to vector<64x128xi32>
    %85 = arith.cmpi eq, %83, %84 : vector<64x128xi32>
    %86 = arith.select %85, %78, %65 : vector<64x128xi1>, vector<64x128xf32>
    %87 = arith.select %85, %65, %78 : vector<64x128xi1>, vector<64x128xf32>
    %c2_i32 = arith.constant 2 : i32
    %88 = vector.broadcast %c2_i32 : i32 to vector<64x128xi32>
    %89 = arith.andi %81, %88 : vector<64x128xi32>
    %c2_i32_29 = arith.constant 2 : i32
    %90 = vector.broadcast %c2_i32_29 : i32 to vector<64x128xi32>
    %91 = arith.cmpi eq, %89, %90 : vector<64x128xi32>
    %cst_30 = arith.constant 0.000000e+00 : f32
    %92 = vector.broadcast %cst_30 : f32 to vector<64x128xf32>
    %93 = arith.subf %92, %86 : vector<64x128xf32>
    %94 = arith.select %91, %93, %86 : vector<64x128xi1>, vector<64x128xf32>
    %c1_i32_31 = arith.constant 1 : i32
    %95 = vector.broadcast %c1_i32_31 : i32 to vector<64x128xi32>
    %96 = arith.addi %81, %95 : vector<64x128xi32>
    %c2_i32_32 = arith.constant 2 : i32
    %97 = vector.broadcast %c2_i32_32 : i32 to vector<64x128xi32>
    %98 = arith.andi %96, %97 : vector<64x128xi32>
    %c2_i32_33 = arith.constant 2 : i32
    %99 = vector.broadcast %c2_i32_33 : i32 to vector<64x128xi32>
    %100 = arith.cmpi eq, %98, %99 : vector<64x128xi32>
    %cst_34 = arith.constant 0.000000e+00 : f32
    %101 = vector.broadcast %cst_34 : f32 to vector<64x128xf32>
    %102 = arith.subf %101, %87 : vector<64x128xf32>
    %103 = arith.select %100, %102, %87 : vector<64x128xi1>, vector<64x128xf32>
    %c0_35 = arith.constant 0 : index
    %104 = arith.index_cast %7 : i32 to index
    %105 = vector.load %arg2[%c0_35, %104] : memref<128x128xf32, #tpu.memory_space<vmem>>, vector<64x128xf32>
    tpu.vector_store %arg2[%c0_35, %104], %94 {strides = array<i32>} : memref<128x128xf32, #tpu.memory_space<vmem>>, vector<64x128xf32>,
    %c64 = arith.constant 64 : index
    %106 = arith.index_cast %7 : i32 to index
    %107 = vector.load %arg2[%c64, %106] : memref<128x128xf32, #tpu.memory_space<vmem>>, vector<64x128xf32>
    tpu.vector_store %arg2[%c64, %106], %103 {strides = array<i32>} : memref<128x128xf32, #tpu.memory_space<vmem>>, vector<64x128xf32>,
    %c1_i32_36 = arith.constant 1 : i32
    return
  }
  func.func @transform_0(%arg0: i32) -> (i32, i32) {
    %c0_i32 = arith.constant 0 : i32
    %c0_i32_0 = arith.constant 0 : i32
    %c0_i32_1 = arith.constant 0 : i32
    return %c0_i32, %c0_i32_0 : i32, i32
  }
  func.func @transform_1(%arg0: i32) -> (i32, i32) {
    %c0_i32 = arith.constant 0 : i32
    %c0_i32_0 = arith.constant 0 : i32
    return %c0_i32, %arg0 : i32, i32
  }
}

</mosaic_0001>

<bundles_post_ra>
// kernel: tpu_custom_call.1
= control target key start
LH: loop header
LB: loop body
LE: loop exit
PB: predicated region body
PF: predicated region fallthrough
CT: control target
= control target key end

     0   :  { %6 = vsyncpa [#allocation3], 0  ;;  %s1112_s0 = inlined_call_operand.vmem [shape: f32[64,2], index: 0, kind: input, shape index: {}]   ;;  %s1113_s1 = inlined_call_operand.hbm [shape: f32[128,256], index: 1, kind: output, shape index: {}]  }
   0x1   :  { %8 = vsyncpa [#allocation3 + $0x1], 0  ;;  %s771_s6 = smov 0   ;;  %s773_s7 = smov 0  }
   0x2   :  { %s775_s8 = smov 0   ;;  %s777_s9 = smov 0  }
   0x3 LB: > { %s792_s10 = sadd.s32 4294967295, %s753_s9   ;;  %s611_s11 = sadd.s32 4294967294, %s753_s9   ;;  %s753_s9 = sphi %s777_s9, %s1147_s9   ;;  %s749_s8 = sphi %s775_s8, %s1146_s8   ;;  %s745_s7 = sphi %s773_s7, %s1145_s7   ;;  %s741_s6 = sphi %s771_s6, %s1144_s6  }
   0x4   : > { %s796_s12 = sadd.s32 1, %s753_s9   ;;  %s42_s13 = sadd.s32 1, %s749_s8 }
   0x5   : > { %s39_s14 = ssub.s32 %s753_s9, %s796_s12  ;;  %p52_p0 = scmp.ne.s32.totalorder %s749_s8, %s745_s7 }
   0x6   : > { %p40_p1 = scmp.eq.s32.totalorder %s39_s14, 0  ;;  %p53_p2 = scmp.eq.s32.totalorder %s792_s10, 1 }
   0x7   : > { %p58_p3 = scmp.ne.s32.totalorder %s745_s7, %s741_s6  ;;  %p59_p4 = scmp.eq.s32.totalorder %s611_s11, 1 }
   0x8   : > { %s807_s15 = scalar_select %p40_p1, %s749_s8, %s42_s13  }
   0x9   : > { %p809_p5 = por %p53_p2, %p52_p0  ;;  %p813_p6 = por %p59_p4, %p58_p3 }
   0xa   : > { %p613_p7 = scmp.ge.s32.totalorder %s753_s9, 1  ;;  %p80_p8 = scmp.lt.s32.totalorder %s753_s9, 3 }
   0xc   : > { %p81_p9 = pnand %p613_p7, %p80_p8 }
   0xd   : > { %s615_s5 = sshll.u32 (!%p81_p9), %s792_s10, 7  ;;  %s92_s11 = sand.u32 (!%p81_p9), 1, %s745_s7  }
   0xe   : > { %84 = sbr.rel (%p81_p9) target bundleno = 251 (0xfb), region = 24  ;;  %s912_s13 = sshll.u32 (!%p81_p9), %s92_s11, 7 }
   0xf   : > { %s950_s14 = scalar_lea.vmem (!%p81_p9), [#allocation2], %s912_s13  ;;  %s619_s18 = sshll.u32 (!%p81_p9), %s792_s10, 3 }
  0x10   : > { %s557_s21 = scalar_lea.hbm (!%p81_p9), %s1113_s1, %s619_s18  ;;  %s558_s22 = sshll.u32 (!%p81_p9), %s950_s14, 4  ;;  %s559_s22 = int_to_ptr.vmem [resolvable:$true] %s558_s22 }
  0x11   : > { %s560_s23 = sshll.u32 (!%p81_p9), %s557_s21, 4  ;;  %s547_s10 = scalar_lea.sflag (!%p81_p9), [#allocation3], %s92_s11  ;;  %s561_s23 = int_to_ptr.hbm [resolvable:$true] %s560_s23 }
  0x12   : > { %s705_s24 = sshra.s32 (!%p81_p9), %s561_s23, 4  ;;  %s711_s28 = scalar_lea.hbm (!%p81_p9), %s1113_s1, 256  ;;  %s706_s24 = int_to_ptr.hbm [resolvable:$true] %s705_s24 }
  0x13   : > { %v99_v0 = vld [vmem:[%s1112_s0 + $0x20] sm:$0xff]  ;;  %v97_v1 = vld [vmem:[%s1112_s0 + $0x10] sm:$0xff]  ;;  %v755_v3 = vmov 0   ;;  %v100_v4 = vld [vmem:[%s1112_s0 + $0x28] sm:$0xff]  ;;  %v756_v9 = vmov 1   ;;  %v757_v10 = vmov 16.0   ;;  %v104_v12 = vlaneseq  ;;  %p712_p13 = scmp.lt.s32.totalorder %s706_s24, %s1113_s1 }
  0x14   : > { %v95_v2 = vld [vmem:[%s1112_s0] sm:$0xff]  ;;  %685 = vset.pattern.permute.xlu2 %v755_v3  ;;  %684 = vset.pattern.permute.xlu1 %v755_v3  ;;  %v98_v5 = vld [vmem:[%s1112_s0 + $0x18] sm:$0xff]  ;;  %v96_v6 = vld [vmem:[%s1112_s0 + $0x8] sm:$0xff]  ;;  %689 = vrcp.f32 %v757_v10  ;;  %v107_v15 = vstv %s615_s5  ;;  %s707_s25 = scalar_lea.hbm %s706_s24, 128 }
  0x15   : > { %683 = vset.pattern.permute.xlu0 %v755_v3  ;;  %152 = vperm.xlu2 %685, %v99_v0   ;;  %v102_v7 = vld [vmem:[%s1112_s0 + $0x38] sm:$0xff]  ;;  %v101_v8 = vld [vmem:[%s1112_s0 + $0x30] sm:$0xff]  ;;  %v105_v14 = vand.u32 127, %v104_v12  ;;  %p708_p10 = scmp.ne.s32.totalorder %s706_s24, %s707_s25  ;;  %p713_p0 = scmp.lt.s32.totalorder %s711_s28, %s707_s25 }
  0x16   : > { %142 = vperm.xlu1 %684, %v97_v1   ;;  %132 = vperm.xlu0 %683, %v95_v2  }
  0x17   : > { %v108_v17 = vadd.s32 %v107_v15, %v105_v14  ;;  %p709_p11 = pnand %p708_p10, %p809_p5  ;;  %p714_p1 = por %p713_p0, %p712_p13 }
  0x19   : > { %v109_v19 = vcvt.s32.f32 %v108_v17  ;;  %p710_p12 = pneg %p709_p11 }
  0x1a   : > { %v690_v11 = vpop.eup %689 }
  0x1b   : > { %v112_v13 = vmul.f32 16.0, %v690_v11  ;;  %vm116_vm0 = vweird.f32 %v690_v11  ;;  %v110_v21 = vadd.f32 0.5, %v109_v19  ;;  %p715_p2 = pnand %p714_p1, %p710_p12 }
  0x1d   : > { %157 = vperm.xlu2 %685, %v100_v4   ;;  %v113_v16 = vsub.f32 1.0, %v112_v13 }
  0x1e   : > { %147 = vperm.xlu1 %684, %v98_v5   ;;  %137 = vperm.xlu0 %683, %v96_v6  }
  0x1f   : > { %v114_v18 = vmul.f32 %v690_v11, %v113_v16 }
  0x21   : > { %v115_v20 = vadd.f32 %v690_v11, %v114_v18 }
  0x23   : > { %v117_v22 = vsel %vm116_vm0, %v690_v11, %v115_v20 }
  0x24   : > { %v118_v23 = vmul.f32 %v117_v22, %v110_v21 }
  0x25   : > { %686 = vset.pattern.permute.xlu2 %v756_v9 }
  0x26   : > { %167 = vperm.xlu1 %684, %v102_v7   ;;  %162 = vperm.xlu0 %683, %v101_v8   ;;  %v119_v24 = vfloor.f32 %v118_v23 }
  0x27   : > { %179 = vperm.xlu2 %686, %v95_v2  }
  0x28   : > { %v120_v26 = vmul.f32 16.0, %v119_v24  ;;  %v126_v29 = vadd.f32 0.5, %v119_v24 }
  0x2a   : > { %v121_v27 = vsub.f32 %v109_v19, %v120_v26  ;;  %v127_v31 = vmul.f32 %v126_v29, %v117_v22 }
  0x2c   : > { %v122_v30 = vadd.f32 0.5, %v121_v27  ;;  %v128_v33 = vmul.f32 2.0, %v127_v31 }
  0x2e   : > { %688 = vset.pattern.permute.xlu1 %v756_v9  ;;  %687 = vset.pattern.permute.xlu0 %v756_v9  ;;  %v123_v32 = vmul.f32 %v122_v30, %v117_v22  ;;  %v844_v36 = vadd.f32 -1.0, %v128_v33 }
  0x2f   : > { %187 = vperm.xlu1 %688, %v97_v1   ;;  %191 = vperm.xlu2 %686, %v98_v5  }
  0x30   : > { %183 = vperm.xlu0 %687, %v96_v6   ;;  %v124_v34 = vmul.f32 2.0, %v123_v32 }
  0x32   : > { %v846_v37 = vadd.f32 -1.0, %v124_v34 }
  0x37   : > { %195 = vperm.xlu1 %688, %v99_v0   ;;  %199 = vperm.xlu2 %686, %v100_v4  }
  0x38   : > { %203 = vperm.xlu0 %687, %v101_v8  }
  0x3f   : > { %207 = vperm.xlu1 %688, %v102_v7  }
  0x6f   : > { %v153_v25 = vpop.permute.xlu2 %152 }
  0x70   : > { %v863_v21 = vmul.f32 %v846_v37, %v153_v25 }
  0x77   : > { %v158_v28 = vpop.permute.xlu2 %157 }
  0x78   : > { %v175_v47 = vmul.f32 %v846_v37, %v158_v28 }
  0x81   : > { %v180_v35 = vpop.permute.xlu2 %179 }
  0x82   : > { %v210_v38 = vmul.f32 %v844_v36, %v180_v35 }
  0x88   : > { %v143_v39 = vpop.permute.xlu1 %142  ;;  %v133_v40 = vpop.permute.xlu0 %132 }
  0x89   : > { %v170_v41 = vmul.f32 %v846_v37, %v133_v40  ;;  %v192_v42 = vpop.permute.xlu2 %191  ;;  %v172_v26 = vmul.f32 %v846_v37, %v143_v39 }
  0x8a   : > { %v213_v46 = vmul.f32 %v844_v36, %v192_v42 }
  0x8b   : > { %v218_v43 = vadd.f32 %v210_v38, %v170_v41 }
  0x8d   : > { %v226_v44 = vmul.f32 0.63661975, %v218_v43 }
  0x8f   : > { %v234_v45 = vadd.f32 0.5, %v226_v44 }
  0x90   : > { %v148_v48 = vpop.permute.xlu1 %147  ;;  %v138_v49 = vpop.permute.xlu0 %137 }
  0x91   : > { %v242_v50 = vfloor.f32 %v234_v45  ;;  %v173_v51 = vmul.f32 %v846_v37, %v148_v48  ;;  %v200_v52 = vpop.permute.xlu2 %199  ;;  %v171_v29 = vmul.f32 %v846_v37, %v138_v49 }
  0x92   : > { %v215_v53 = vmul.f32 %v844_v36, %v200_v52 }
  0x93   : > { %v250_v54 = vmul.f32 1.5707855, %v242_v50  ;;  %v266_v55 = vmul.f32 1.0804334e-05, %v242_v50  ;;  %v623_v56 = vcvt.f32.s32 %v242_v50  ;;  %v221_v57 = vadd.f32 %v213_v46, %v173_v51 }
  0x94   : > { %v223_v58 = vadd.f32 %v215_v53, %v175_v47 }
  0x95   : > { %v258_v59 = vsub.f32 %v218_v43, %v250_v54  ;;  %v229_v60 = vmul.f32 0.63661975, %v221_v57  ;;  %v418_v63 = vand.u32 3, %v623_v56 }
  0x96   : > { %v231_v61 = vmul.f32 0.63661975, %v223_v58 }
  0x97   : > { %v854_v62 = vsub.f32 %v258_v59, %v266_v55  ;;  %v237_v0 = vadd.f32 0.5, %v229_v60  ;;  %v426_v9 = vand.u32 1, %v418_v63  ;;  %v490_v10 = vadd.s32 1, %v418_v63 }
  0x98   : > { %v239_v1 = vadd.f32 0.5, %v231_v61  ;;  %v858_v3 = vpop.permute.xlu1 %167  ;;  %v163_v4 = vpop.permute.xlu0 %162  ;;  %v458_v27 = vand.u32 2, %v418_v63 }
  0x99   : > { %v282_v2 = vmul.f32 %v854_v62, %v854_v62  ;;  %v245_v5 = vfloor.f32 %v237_v0  ;;  %v498_v32 = vand.u32 2, %v490_v10  ;;  %vm871_vm1 = vcmp.eq.s32.totalorder %v426_v9, 1 }
  0x9a   : > { %v247_v6 = vfloor.f32 %v239_v1  ;;  %v888_v42 = vmul.f32 %v846_v37, %v163_v4  ;;  %vm894_vm2 = vcmp.eq.s32.totalorder %v458_v27, 2 }
  0x9b   : > { %v290_v7 = vmul.f32 -0.0001984127, %v282_v2  ;;  %v346_v8 = vmul.f32 2.4801588e-05, %v282_v2  ;;  %v253_v11 = vmul.f32 1.5707855, %v245_v5  ;;  %v629_v12 = vcvt.f32.s32 %v245_v5 }
  0x9c   : > { %v255_v13 = vmul.f32 1.5707855, %v247_v6  ;;  %v269_v16 = vmul.f32 1.0804334e-05, %v245_v5  ;;  %v633_v20 = vcvt.f32.s32 %v247_v6  ;;  %v271_v24 = vmul.f32 1.0804334e-05, %v247_v6 }
  0x9d   : > { %v298_v14 = vadd.f32 0.008333334, %v290_v7  ;;  %v354_v15 = vadd.f32 -0.0013888889, %v346_v8  ;;  %v261_v17 = vsub.f32 %v221_v57, %v253_v11  ;;  %v860_v18 = vand.u32 3, %v629_v12 }
  0x9e   : > { %v263_v19 = vsub.f32 %v223_v58, %v255_v13  ;;  %v880_v38 = vand.u32 3, %v633_v20  ;;  %vm898_vm3 = vcmp.eq.s32.totalorder %v498_v32, 2 }
  0x9f   : > { %v306_v22 = vmul.f32 %v298_v14, %v282_v2  ;;  %v362_v23 = vmul.f32 %v354_v15, %v282_v2  ;;  %v866_v28 = vsub.f32 %v261_v17, %v269_v16  ;;  %v493_v35 = vadd.s32 1, %v860_v18 }
  0xa0   : > { %v869_v33 = vsub.f32 %v263_v19, %v271_v24  ;;  %v429_v47 = vand.u32 1, %v860_v18  ;;  %v461_v48 = vand.u32 2, %v860_v18  ;;  %v431_v58 = vand.u32 1, %v880_v38 }
  0xa1   : > { %v314_v30 = vadd.f32 -0.16666667, %v306_v22  ;;  %v370_v31 = vadd.f32 0.041666668, %v362_v23  ;;  %v877_v25 = vmul.f32 %v866_v28, %v866_v28  ;;  %v188_v43 = vpop.permute.xlu1 %187  ;;  %v501_v57 = vand.u32 2, %v493_v35 }
  0xa2   : > { %v885_v41 = vmul.f32 %v869_v33, %v869_v33  ;;  %v184_v44 = vpop.permute.xlu0 %183  ;;  %v463_v63 = vand.u32 2, %v880_v38  ;;  %v212_v5 = vmul.f32 %v844_v36, %v188_v43  ;;  %vm924_vm4 = vcmp.eq.s32.totalorder %v429_v47, 1 }
  0xa3   : > { %v322_v39 = vmul.f32 %v314_v30, %v282_v2  ;;  %v378_v40 = vmul.f32 %v370_v31, %v282_v2  ;;  %v293_v45 = vmul.f32 -0.0001984127, %v877_v25  ;;  %v349_v46 = vmul.f32 2.4801588e-05, %v877_v25 }
  0xa4   : > { %v295_v53 = vmul.f32 -0.0001984127, %v885_v41  ;;  %v351_v54 = vmul.f32 2.4801588e-05, %v885_v41  ;;  %v211_v8 = vmul.f32 %v844_v36, %v184_v44  ;;  %v918_v11 = vadd.f32 %v212_v5, %v172_v26 }
  0xa5   : > { %v330_v49 = vadd.f32 1.0, %v322_v39  ;;  %v386_v50 = vadd.f32 -0.5, %v378_v40  ;;  %v301_v55 = vadd.f32 0.008333334, %v293_v45  ;;  %v357_v56 = vadd.f32 -0.0013888889, %v349_v46 }
  0xa6   : > { %v303_v60 = vadd.f32 0.008333334, %v295_v53  ;;  %v359_v61 = vadd.f32 -0.0013888889, %v351_v54  ;;  %vm930_vm5 = vcmp.eq.s32.totalorder %v431_v58, 1  ;;  %v219_v27 = vadd.f32 %v211_v8, %v171_v29 }
  0xa7   : > { %v394_v59 = vmul.f32 %v386_v50, %v282_v2  ;;  %v338_v0 = vmul.f32 %v330_v49, %v854_v62  ;;  %v309_v1 = vmul.f32 %v301_v55, %v877_v25  ;;  %v365_v4 = vmul.f32 %v357_v56, %v877_v25 }
  0xa8   : > { %v311_v7 = vmul.f32 %v303_v60, %v885_v41  ;;  %v367_v2 = vmul.f32 %v359_v61, %v885_v41  ;;  %v495_v62 = vadd.s32 1, %v880_v38  ;;  %v228_v26 = vmul.f32 0.63661975, %v918_v11 }
  0xa9   : > { %v402_v6 = vadd.f32 1.0, %v394_v59  ;;  %v317_v9 = vadd.f32 -0.16666667, %v309_v1  ;;  %v373_v10 = vadd.f32 0.041666668, %v365_v4  ;;  %v196_v30 = vpop.permute.xlu1 %195  ;;  %vm941_vm6 = vcmp.eq.s32.totalorder %v461_v48, 2 }
  0xaa   : > { %v319_v15 = vadd.f32 -0.16666667, %v311_v7  ;;  %v375_v16 = vadd.f32 0.041666668, %v367_v2  ;;  %v204_v31 = vpop.permute.xlu0 %203  ;;  %vm945_vm7 = vcmp.eq.s32.totalorder %v501_v57, 2  ;;  %v236_v44 = vadd.f32 0.5, %v228_v26 }
  0xab   : > { %v442_v12 = vsel %vm871_vm1, %v402_v6, %v338_v0  ;;  %v450_v13 = vsel %vm871_vm1, %v338_v0, %v402_v6  ;;  %v325_v19 = vmul.f32 %v317_v9, %v877_v25  ;;  %v381_v20 = vmul.f32 %v373_v10, %v877_v25 }
  0xac   : > { %v474_v17 = vsub.f32 0.0, %v442_v12  ;;  %v514_v18 = vsub.f32 0.0, %v450_v13  ;;  %v327_v23 = vmul.f32 %v319_v15, %v885_v41  ;;  %v383_v24 = vmul.f32 %v375_v16, %v885_v41 }
  0xad   : > { %v333_v35 = vadd.f32 1.0, %v325_v19  ;;  %v389_v38 = vadd.f32 -0.5, %v381_v20  ;;  %v227_v45 = vmul.f32 0.63661975, %v219_v27  ;;  %vm955_vm8 = vcmp.eq.s32.totalorder %v463_v63, 2 }
  0xae   : > { %v482_v32 = vsel %vm894_vm2, %v474_v17, %v442_v12  ;;  %v522_v34 = vsel %vm898_vm3, %v514_v18, %v450_v13  ;;  %v335_v29 = vadd.f32 1.0, %v327_v23  ;;  %v391_v43 = vadd.f32 -0.5, %v383_v24 }
  0xaf   : > { %530 = vst [vmem:[%s950_s14] sm:$0xff] %v482_v32  ;;  %v397_v46 = vmul.f32 %v389_v38, %v877_v25  ;;  %v214_v48 = vmul.f32 %v844_v36, %v196_v30  ;;  %v216_v49 = vmul.f32 %v844_v36, %v204_v31  ;;  %v503_v51 = vand.u32 2, %v495_v62 }
  0xb0   : > { %538 = vst [vmem:[%s950_s14 + $0x40] sm:$0xff] %v522_v34  ;;  %v399_v50 = vmul.f32 %v391_v43, %v885_v41  ;;  %v244_v52 = vfloor.f32 %v236_v44  ;;  %v235_v53 = vadd.f32 0.5, %v227_v45  ;;  %v341_v54 = vmul.f32 %v333_v35, %v866_v28 }
  0xb1   : > { %v405_v55 = vadd.f32 1.0, %v397_v46  ;;  %v343_v56 = vmul.f32 %v335_v29, %v869_v33  ;;  %v965_v25 = vadd.f32 %v214_v48, %v863_v21  ;;  %v968_v60 = vadd.f32 %v216_v49, %v888_v42 }
  0xb2   : > { %v407_v57 = vadd.f32 1.0, %v399_v50  ;;  %v252_v58 = vmul.f32 1.5707855, %v244_v52  ;;  %v268_v59 = vmul.f32 1.0804334e-05, %v244_v52  ;;  %v627_v28 = vcvt.f32.s32 %v244_v52  ;;  %v208_v50 = vpop.permute.xlu1 %207 }
  0xb3   : > { %v445_v41 = vsel %vm924_vm4, %v405_v55, %v341_v54  ;;  %v453_v61 = vsel %vm924_vm4, %v341_v54, %v405_v55  ;;  %v243_v63 = vfloor.f32 %v235_v53  ;;  %v230_v6 = vmul.f32 0.63661975, %v965_v25 }
  0xb4   : > { %v477_v0 = vsub.f32 0.0, %v445_v41  ;;  %v517_v33 = vsub.f32 0.0, %v453_v61  ;;  %v447_v21 = vsel %vm930_vm5, %v407_v57, %v343_v56  ;;  %v455_v1 = vsel %vm930_vm5, %v343_v56, %v407_v57 }
  0xb5   : > { %v479_v42 = vsub.f32 0.0, %v447_v21  ;;  %v519_v4 = vsub.f32 0.0, %v455_v1  ;;  %v260_v5 = vsub.f32 %v918_v11, %v252_v58  ;;  %vm511_vm9 = vcmp.eq.s32.totalorder %v503_v51, 2 }
  0xb6   : > { %v485_v7 = vsel %vm941_vm6, %v477_v0, %v445_v41  ;;  %v525_v2 = vsel %vm945_vm7, %v517_v33, %v453_v61  ;;  %v251_v8 = vmul.f32 1.5707855, %v243_v63  ;;  %v420_v11 = vand.u32 3, %v627_v28 }
  0xb7   : > { %533 = vst [vmem:[%s950_s14 + $0x18] sm:$0xff] %v485_v7  ;;  %v487_v9 = vsel %vm955_vm8, %v479_v42, %v447_v21  ;;  %v527_v10 = vsel %vm511_vm9, %v519_v4, %v455_v1  ;;  %v987_v62 = vsub.f32 %v260_v5, %v268_v59  ;;  %v267_v13 = vmul.f32 1.0804334e-05, %v243_v63 }
  0xb8   : > { %541 = vst [vmem:[%s950_s14 + $0x58] sm:$0xff] %v525_v2  ;;  %v259_v12 = vsub.f32 %v219_v27, %v251_v8  ;;  %v238_v15 = vadd.f32 0.5, %v230_v6  ;;  %v232_v16 = vmul.f32 0.63661975, %v968_v60  ;;  %v625_v18 = vcvt.f32.s32 %v243_v63 }
  0xb9   : > { %535 = vst [vmem:[%s950_s14 + $0x28] sm:$0xff] %v487_v9  ;;  %v284_v14 = vmul.f32 %v987_v62, %v987_v62  ;;  %v492_v23 = vadd.s32 1, %v420_v11  ;;  %v1001_v27 = vmul.f32 %v846_v37, %v858_v3  ;;  %v428_v32 = vand.u32 1, %v420_v11 }
  0xba   : > { %543 = vst [vmem:[%s950_s14 + $0x68] sm:$0xff] %v527_v10  ;;  %v995_v17 = vsub.f32 %v259_v12, %v267_v13  ;;  %v246_v22 = vfloor.f32 %v238_v15  ;;  %v240_v26 = vadd.f32 0.5, %v232_v16  ;;  %v419_v38 = vand.u32 3, %v625_v18 }
  0xbb   : > { %v292_v19 = vmul.f32 -0.0001984127, %v284_v14  ;;  %v348_v20 = vmul.f32 2.4801588e-05, %v284_v14  ;;  %v460_v29 = vand.u32 2, %v420_v11  ;;  %v500_v44 = vand.u32 2, %v492_v23 }
  0xbc   : > { %v283_v24 = vmul.f32 %v995_v17, %v995_v17  ;;  %v254_v43 = vmul.f32 1.5707855, %v246_v22  ;;  %v1003_v47 = vfloor.f32 %v240_v26  ;;  %v270_v3 = vmul.f32 1.0804334e-05, %v246_v22 }
  0xbd   : > { %v300_v30 = vadd.f32 0.008333334, %v292_v19  ;;  %v356_v31 = vadd.f32 -0.0013888889, %v348_v20  ;;  %vm1006_vm10 = vcmp.eq.s32.totalorder %v428_v32, 1  ;;  %v427_v54 = vand.u32 1, %v419_v38 }
  0xbe   : > { %v291_v34 = vmul.f32 -0.0001984127, %v283_v24  ;;  %v347_v35 = vmul.f32 2.4801588e-05, %v283_v24  ;;  %v262_v37 = vsub.f32 %v965_v25, %v254_v43  ;;  %v459_v55 = vand.u32 2, %v419_v38 }
  0xbf   : > { %v308_v39 = vmul.f32 %v300_v30, %v284_v14  ;;  %v364_v40 = vmul.f32 %v356_v31, %v284_v14  ;;  %v491_v58 = vadd.s32 1, %v419_v38  ;;  %v256_v28 = vmul.f32 1.5707855, %v1003_v47 }
  0xc0   : > { %v299_v45 = vadd.f32 0.008333334, %v291_v34  ;;  %v355_v46 = vadd.f32 -0.0013888889, %v347_v35  ;;  %v1010_v59 = vsub.f32 %v262_v37, %v270_v3  ;;  %v217_v25 = vmul.f32 %v844_v36, %v208_v50 }
  0xc1   : > { %v316_v48 = vadd.f32 -0.16666667, %v308_v39  ;;  %v372_v49 = vadd.f32 0.041666668, %v364_v40  ;;  %vm1014_vm11 = vcmp.eq.s32.totalorder %v460_v29, 2  ;;  %vm1018_vm12 = vcmp.eq.s32.totalorder %v500_v44, 2 }
  0xc2   : > { %v307_v52 = vmul.f32 %v299_v45, %v283_v24  ;;  %v363_v53 = vmul.f32 %v355_v46, %v283_v24  ;;  %v286_v1 = vmul.f32 %v1010_v59, %v1010_v59  ;;  %vm1024_vm13 = vcmp.eq.s32.totalorder %v427_v54, 1 }
  0xc3   : > { %v324_v56 = vmul.f32 %v316_v48, %v284_v14  ;;  %v380_v57 = vmul.f32 %v372_v49, %v284_v14  ;;  %v631_v36 = vcvt.f32.s32 %v246_v22  ;;  %v499_v7 = vand.u32 2, %v491_v58 }
  0xc4   : > { %v315_v41 = vadd.f32 -0.16666667, %v307_v52  ;;  %v371_v61 = vadd.f32 0.041666668, %v363_v53  ;;  %v294_v2 = vmul.f32 -0.0001984127, %v286_v1  ;;  %v264_v12 = vsub.f32 %v968_v60, %v256_v28 }
  0xc5   : > { %v332_v63 = vadd.f32 1.0, %v324_v56  ;;  %v388_v0 = vadd.f32 -0.5, %v380_v57  ;;  %v350_v8 = vmul.f32 2.4801588e-05, %v286_v1  ;;  %vm1028_vm14 = vcmp.eq.s32.totalorder %v459_v55, 2 }
  0xc6   : > { %v323_v42 = vmul.f32 %v315_v41, %v283_v24  ;;  %v379_v4 = vmul.f32 %v371_v61, %v283_v24  ;;  %v272_v13 = vmul.f32 1.0804334e-05, %v1003_v47  ;;  %v302_v18 = vadd.f32 0.008333334, %v294_v2 }
  0xc7   : > { %v396_v6 = vmul.f32 %v388_v0, %v284_v14  ;;  %v340_v15 = vmul.f32 %v332_v63, %v987_v62  ;;  %v358_v19 = vadd.f32 -0.0013888889, %v350_v8  ;;  %v422_v22 = vand.u32 3, %v631_v36 }
  0xc8   : > { %v331_v9 = vadd.f32 1.0, %v323_v42  ;;  %v387_v10 = vadd.f32 -0.5, %v379_v4  ;;  %v1036_v23 = vsub.f32 %v264_v12, %v272_v13  ;;  %v310_v30 = vmul.f32 %v302_v18, %v286_v1 }
  0xc9   : > { %v404_v16 = vadd.f32 1.0, %v396_v6  ;;  %v366_v31 = vmul.f32 %v358_v19, %v286_v1  ;;  %vm1044_vm15 = vcmp.eq.s32.totalorder %v499_v7, 2  ;;  %v1049_v39 = vadd.f32 %v217_v25, %v1001_v27 }
  0xca   : > { %v339_v14 = vmul.f32 %v331_v9, %v995_v17  ;;  %v395_v20 = vmul.f32 %v387_v10, %v283_v24  ;;  %v288_v17 = vmul.f32 %v1036_v23, %v1036_v23  ;;  %v318_v35 = vadd.f32 -0.16666667, %v310_v30 }
  0xcb   : > { %v444_v26 = vsel %vm1006_vm10, %v404_v16, %v340_v15  ;;  %v452_v60 = vsel %vm1006_vm10, %v340_v15, %v404_v16  ;;  %v374_v38 = vadd.f32 0.041666668, %v366_v31  ;;  %v494_v49 = vadd.s32 1, %v422_v22 }
  0xcc   : > { %v476_v32 = vsub.f32 0.0, %v444_v26  ;;  %v516_v62 = vsub.f32 0.0, %v452_v60  ;;  %v403_v34 = vadd.f32 1.0, %v395_v20  ;;  %v326_v48 = vmul.f32 %v318_v35, %v286_v1 }
  0xcd   : > { %v382_v27 = vmul.f32 %v374_v38, %v286_v1  ;;  %v296_v37 = vmul.f32 -0.0001984127, %v288_v17  ;;  %v352_v3 = vmul.f32 2.4801588e-05, %v288_v17  ;;  %v635_v50 = vcvt.f32.s32 %v1003_v47 }
  0xce   : > { %v484_v40 = vsel %vm1014_vm11, %v476_v32, %v444_v26  ;;  %v524_v29 = vsel %vm1018_vm12, %v516_v62, %v452_v60  ;;  %v443_v43 = vsel %vm1024_vm13, %v403_v34, %v339_v14  ;;  %v451_v44 = vsel %vm1024_vm13, %v339_v14, %v403_v34 }
  0xcf   : > { %532 = vst [vmem:[%s950_s14 + $0x10] sm:$0xff] %v484_v40  ;;  %v475_v45 = vsub.f32 0.0, %v443_v43  ;;  %v515_v46 = vsub.f32 0.0, %v451_v44  ;;  %v334_v53 = vadd.f32 1.0, %v326_v48  ;;  %v390_v54 = vadd.f32 -0.5, %v382_v27 }
  0xd0   : > { %540 = vst [vmem:[%s950_s14 + $0x50] sm:$0xff] %v524_v29  ;;  %v430_v55 = vand.u32 1, %v422_v22  ;;  %v304_v56 = vadd.f32 0.008333334, %v296_v37  ;;  %v360_v57 = vadd.f32 -0.0013888889, %v352_v3 }
  0xd1   : > { %v483_v51 = vsel %vm1028_vm14, %v475_v45, %v443_v43  ;;  %v523_v52 = vsel %vm1044_vm15, %v515_v46, %v451_v44  ;;  %v398_v58 = vmul.f32 %v390_v54, %v286_v1  ;;  %v462_v41 = vand.u32 2, %v422_v22 }
  0xd2   : > { %531 = vst [vmem:[%s950_s14 + $0x8] sm:$0xff] %v483_v51  ;;  %v312_v61 = vmul.f32 %v304_v56, %v288_v17  ;;  %v368_v28 = vmul.f32 %v360_v57, %v288_v17  ;;  %v233_v25 = vmul.f32 0.63661975, %v1049_v39  ;;  %v342_v47 = vmul.f32 %v334_v53, %v1010_v59 }
  0xd3   : > { %539 = vst [vmem:[%s950_s14 + $0x48] sm:$0xff] %v523_v52  ;;  %v406_v63 = vadd.f32 1.0, %v398_v58  ;;  %v502_v0 = vand.u32 2, %v494_v49  ;;  %v424_v33 = vand.u32 3, %v635_v50  ;;  %vm438_vm0 = vcmp.eq.s32.totalorder %v430_v55, 1 }
  0xd4   : > { %v320_v21 = vadd.f32 -0.16666667, %v312_v61  ;;  %v376_v42 = vadd.f32 0.041666668, %v368_v28  ;;  %v241_v4 = vadd.f32 0.5, %v233_v25  ;;  %vm470_vm1 = vcmp.eq.s32.totalorder %v462_v41, 2 }
  0xd5   : > { %v446_v5 = vsel %vm438_vm0, %v406_v63, %v342_v47  ;;  %v454_v36 = vsel %vm438_vm0, %v342_v47, %v406_v63  ;;  %vm510_vm2 = vcmp.eq.s32.totalorder %v502_v0, 2  ;;  %v496_v8 = vadd.s32 1, %v424_v33 }
  0xd6   : > { %v478_v6 = vsub.f32 0.0, %v446_v5  ;;  %v518_v1 = vsub.f32 0.0, %v454_v36  ;;  %v328_v7 = vmul.f32 %v320_v21, %v288_v17  ;;  %v384_v2 = vmul.f32 %v376_v42, %v288_v17 }
  0xd7   : > { %v249_v9 = vfloor.f32 %v241_v4  ;;  %v432_v13 = vand.u32 1, %v424_v33  ;;  %v464_v22 = vand.u32 2, %v424_v33  ;;  %v504_v26 = vand.u32 2, %v496_v8 }
  0xd8   : > { %v486_v59 = vsel %vm470_vm1, %v478_v6, %v446_v5  ;;  %v526_v10 = vsel %vm510_vm2, %v518_v1, %v454_v36  ;;  %v336_v11 = vadd.f32 1.0, %v328_v7  ;;  %v392_v12 = vadd.f32 -0.5, %v384_v2 }
  0xd9   : > { %534 = vst [vmem:[%s950_s14 + $0x20] sm:$0xff] %v486_v59  ;;  %v257_v15 = vmul.f32 1.5707855, %v249_v9  ;;  %v273_v19 = vmul.f32 1.0804334e-05, %v249_v9  ;;  %vm440_vm3 = vcmp.eq.s32.totalorder %v432_v13, 1  ;;  %v637_v40 = vcvt.f32.s32 %v249_v9 }
  0xda   : > { %542 = vst [vmem:[%s950_s14 + $0x60] sm:$0xff] %v526_v10  ;;  %v400_v16 = vmul.f32 %v392_v12, %v288_v17  ;;  %v344_v14 = vmul.f32 %v336_v11, %v1036_v23  ;;  %vm472_vm4 = vcmp.eq.s32.totalorder %v464_v22, 2  ;;  %vm512_vm5 = vcmp.eq.s32.totalorder %v504_v26, 2 }
  0xdb   : > { %v265_v18 = vsub.f32 %v1049_v39, %v257_v15  ;;  %v425_v46 = vand.u32 3, %v637_v40 }
  0xdc   : > { %v408_v20 = vadd.f32 1.0, %v400_v16 }
  0xdd   : > { %v281_v60 = vsub.f32 %v265_v18, %v273_v19  ;;  %v497_v3 = vadd.s32 1, %v425_v46  ;;  %v433_v50 = vand.u32 1, %v425_v46  ;;  %v465_v54 = vand.u32 2, %v425_v46 }
  0xde   : > { %v448_v30 = vsel %vm440_vm3, %v408_v20, %v344_v14  ;;  %v456_v31 = vsel %vm440_vm3, %v344_v14, %v408_v20 }
  0xdf   : > { %v480_v32 = vsub.f32 0.0, %v448_v30  ;;  %v520_v62 = vsub.f32 0.0, %v456_v31  ;;  %v289_v34 = vmul.f32 %v281_v60, %v281_v60  ;;  %v505_v55 = vand.u32 2, %v497_v3 }
  0xe0   : > { %vm441_vm6 = vcmp.eq.s32.totalorder %v433_v50, 1  ;;  %vm473_vm7 = vcmp.eq.s32.totalorder %v465_v54, 2 }
  0xe1   : > { %v488_v17 = vsel %vm472_vm4, %v480_v32, %v448_v30  ;;  %v528_v24 = vsel %vm512_vm5, %v520_v62, %v456_v31  ;;  %v297_v35 = vmul.f32 -0.0001984127, %v289_v34  ;;  %v353_v38 = vmul.f32 2.4801588e-05, %v289_v34 }
  0xe2   : > { %536 = vst [vmem:[%s950_s14 + $0x30] sm:$0xff] %v488_v17  ;;  %vm513_vm8 = vcmp.eq.s32.totalorder %v505_v55, 2 }
  0xe3   : > { %544 = vst [vmem:[%s950_s14 + $0x70] sm:$0xff] %v528_v24  ;;  %v305_v23 = vadd.f32 0.008333334, %v297_v35  ;;  %v361_v39 = vadd.f32 -0.0013888889, %v353_v38 }
  0xe5   : > { %v313_v29 = vmul.f32 %v305_v23, %v289_v34  ;;  %v369_v43 = vmul.f32 %v361_v39, %v289_v34 }
  0xe7   : > { %v321_v44 = vadd.f32 -0.16666667, %v313_v29  ;;  %v377_v45 = vadd.f32 0.041666668, %v369_v43 }
  0xe9   : > { %v329_v48 = vmul.f32 %v321_v44, %v289_v34  ;;  %v385_v27 = vmul.f32 %v377_v45, %v289_v34 }
  0xeb   : > { %v337_v49 = vadd.f32 1.0, %v329_v48  ;;  %v393_v37 = vadd.f32 -0.5, %v385_v27 }
  0xed   : > { %v401_v51 = vmul.f32 %v393_v37, %v289_v34  ;;  %v345_v52 = vmul.f32 %v337_v49, %v281_v60 }
  0xef   : > { %v409_v53 = vadd.f32 1.0, %v401_v51 }
  0xf1   : > { %v449_v56 = vsel %vm441_vm6, %v409_v53, %v345_v52  ;;  %v457_v57 = vsel %vm441_vm6, %v345_v52, %v409_v53 }
  0xf2   : > { %v481_v58 = vsub.f32 0.0, %v449_v56  ;;  %v521_v41 = vsub.f32 0.0, %v457_v57 }
  0xf4   : > { %v489_v61 = vsel %vm473_vm7, %v481_v58, %v449_v56  ;;  %v529_v28 = vsel %vm513_vm8, %v521_v41, %v457_v57 }
  0xf5   : > { %537 = vst [vmem:[%s950_s14 + $0x38] sm:$0xff] %v489_v61 }
  0xf6   : > { %545 = vst [vmem:[%s950_s14 + $0x78] sm:$0xff] %v529_v28 }
  0xf7   : > { %718 = shalt.err (!%p715_p2)
}
  0xf8   : > { %s758_s2 = smov 128   ;;  %s759_s3 = smov 256  }
  0xf9   : > { %s760_s4 = smov 8  }
  0xfa   : > { %638 = dma.vmem_to_hbm [thread:$0]  (%p809_p5), %s559_s22, 2048, %s561_s23, %s547_s10, %s758_s2, %s759_s3, %s760_s4  }
  0xfb PF: > { %p644_p3 = scmp.ge.s32.totalorder %s753_s9, 2  ;;  %s575_s5 = sand.u32 1, %s741_s6  }
  0xfc   : > { %s576_s11 = scalar_lea.sflag [#allocation3], %s575_s5 }
  0xfd   : > { %p641_p4 = pnand %p644_p3, %p813_p6 }
  0xff   : > { %p642_p7 = pneg %p641_p4 }
 0x101   : > { %736 = dma.done.wait (%p642_p7), %s576_s11, 2048  }
 0x102   : > { %738 = vsyncadd (%p642_p7), %s576_s11, 4294965248  ;;  %p11_p8 = scmp.ge.s32.totalorder %s796_s12, 4   ;;  %s1144_s6 = smov %s745_s7 }
 0x103   : > { %s1145_s7 = smov %s749_s8  ;;  %s1146_s8 = smov %s807_s15 }
 0x104   : > { %s1147_s9 = smov %s796_s12  ;;  %13 = sbr.rel (!%p11_p8) target bundleno = 3 (0x3), region = 56 }
 0x109   :  { %582 = vsyncpa [#allocation3], 1 }
 0x10a   :  { %584 = vsyncpa [#allocation3 + $0x1], 1 }

</bundles_post_ra>
